<compile_context>
chip_gen: v6e
topology: v6e:2x2x1
jax: 0.10.0
libtpu: 0.0.40
codegen_flags: <defaults>
</compile_context>

<pallas_src>
import math
from functools import partial

import numpy as np
import jax
import jax.numpy as jnp
from jax.experimental import pallas as pl
from jax.experimental.pallas import tpu as pltpu


def _separable_gaussian_taps(kernel_size, sigma, dim=2):
    """Per-axis 1D gaussian taps. Their outer product equals the torch
    __init__ 2D weight (the total-sum normalization factorizes per axis)."""
    if isinstance(kernel_size, (int, float)):
        kernel_size = [int(kernel_size)] * dim
    if isinstance(sigma, (int, float)):
        sigma = [float(sigma)] * dim
    taps = []
    for size, std in zip(kernel_size, sigma):
        mean = (size - 1) / 2.0
        xs = np.arange(size, dtype=np.float64)
        g = np.exp(-(((xs - mean) / std) ** 2) / 2.0) / (std * math.sqrt(2.0 * math.pi))
        g = g / g.sum()
        taps.append([float(v) for v in g])   # python-float immediates
    return taps


def _sep_gauss_kernel(x_ref, o_ref, *, wh, ww, Ho, Wo):
    # x_ref: VMEM (Nb, H, W) block of images; o_ref: VMEM (Nb, Ho, Wo) block.
    # Weights wh/ww are trace-time python floats (folded into the multiplies).
    xf = x_ref[...].astype(jnp.float32)          # single load + widen (hoisted)

    # Pass 1: horizontal taps (lane axis).
    tmp = ww[0] * xf[:, :, 0:Wo]
    for j in range(1, len(ww)):
        tmp = tmp + ww[j] * xf[:, :, j:j + Wo]

    # Pass 2: vertical taps (sublane axis).
    out = wh[0] * tmp[:, 0:Ho, :]
    for i in range(1, len(wh)):
        out = out + wh[i] * tmp[:, i:i + Ho, :]

    o_ref[...] = out.astype(o_ref.dtype)


def _pick_images_per_block(N, H, W, itemsize):
    """Images per grid step: fill a conservative VMEM budget (sized for the
    v7x 64 MiB VMEM) but keep >= 2 grid steps so both v7x TCs get work."""
    # Per-image footprint: double-buffered input block, f32 working copy,
    # horizontal-pass temporary, output value, double-buffered output block.
    per_image = (2 * itemsize + 5 * 4) * H * W
    budget = 10 * 1024 * 1024
    nb = max(1, budget // per_image)
    if N >= 2:
        nb = min(nb, max(1, N // 2))             # >= 2 parallel grid steps
    # Largest divisor of N that is <= nb, so the grid tiles N exactly.
    best = 1
    for d in range(1, N + 1):
        if N % d == 0 and d <= nb:
            best = d
    return best


def gaussian_smoothing(x, channels, kernel_size, sigma, dim=2):
    """Forward pass of GaussianSmoothing: depthwise conv, stride 1, no padding."""
    assert dim == 2, "this kernel implements the dim=2 (conv2d) case"
    B, C, H, W = x.shape
    assert C == channels

    wh, ww = _separable_gaussian_taps(kernel_size, sigma, dim)
    Kh, Kw = len(wh), len(ww)
    Ho, Wo = H - Kh + 1, W - Kw + 1

    # Weights are shared across channels -> fold (B, C) into one image axis.
    N = B * C
    x_n = x.reshape(N, H, W)

    Nb = _pick_images_per_block(N, H, W, x.dtype.itemsize)
    grid = (N // Nb,)

    kernel_fn = partial(_sep_gauss_kernel, wh=wh, ww=ww, Ho=Ho, Wo=Wo)

    out = pl.pallas_call(
        kernel_fn,
        out_shape=jax.ShapeDtypeStruct((N, Ho, Wo), x.dtype),
        grid_spec=pltpu.PrefetchScalarGridSpec(
            num_scalar_prefetch=0,
            grid=grid,
            in_specs=[pl.BlockSpec((Nb, H, W), lambda n: (n, 0, 0))],
            out_specs=pl.BlockSpec((Nb, Ho, Wo), lambda n: (n, 0, 0)),
        ),
        compiler_params=pltpu.CompilerParams(
            dimension_semantics=("parallel",),
            vmem_limit_bytes=48 * 1024 * 1024,
        ),
    )(x_n)
    return out.reshape(B, C, Ho, Wo)


if __name__ == "__main__":
    # Small shapes consistent with the module's conv2d forward.
    B, C, H, W = 2, 4, 16, 16
    kernel_size, sigma = 3, 1.0

    key = jax.random.PRNGKey(0)
    x = jax.random.normal(key, (B, C, H, W), dtype=jnp.float32)

    out = gaussian_smoothing(x, channels=C, kernel_size=kernel_size, sigma=sigma)
    out = jax.block_until_ready(out)

    # Cross-check against XLA's depthwise conv (same semantics as
    # F.conv2d(groups=C) with the torch-constructed gaussian weight).
    wh, ww = _separable_gaussian_taps(kernel_size, sigma)
    k2d = jnp.asarray(np.outer(np.asarray(wh), np.asarray(ww)), dtype=jnp.float32)
    w_oihw = jnp.tile(k2d.reshape(1, 1, kernel_size, kernel_size), (C, 1, 1, 1))
    ref = jax.lax.conv_general_dilated(
        x, w_oihw, window_strides=(1, 1), padding="VALID",
        dimension_numbers=("NCHW", "OIHW", "NCHW"), feature_group_count=C,
    )
    assert out.shape == (B, C, H - kernel_size + 1, W - kernel_size + 1)
    assert jnp.allclose(out, ref, rtol=1e-5, atol=1e-5)

    print("KERNEL_OK")
</pallas_src>

<mosaic_0001>
module attributes {stable_mosaic.version = 11 : i64} {
  func.func @_sep_gauss_kernel(%arg0: i32, %arg1: memref<4x16x16xf32, #tpu.memory_space<vmem>>, %arg2: memref<4x14x14xf32, #tpu.memory_space<vmem>>) attributes {dimension_semantics = [#tpu.dimension_semantics<parallel>], iteration_bounds = array<i64: 2>, scalar_prefetch = 0 : i64, scratch_operands = 0 : i64, tpu.core_type = #tpu.core_type<tc>, window_params = [{transform_indices = @transform_0, window_bounds = array<i64: 4, 16, 16>}, {transform_indices = @transform_1, window_bounds = array<i64: 4, 14, 14>}]} {
    %c0 = arith.constant 0 : index
    %c0_0 = arith.constant 0 : index
    %c0_1 = arith.constant 0 : index
    %0 = vector.load %arg1[%c0, %c0_0, %c0_1] : memref<4x16x16xf32, #tpu.memory_space<vmem>>, vector<4x16x16xf32>
    %1 = vector.extract_strided_slice %0 {offsets = [0, 0, 0], sizes = [4, 16, 14], strides = [1, 1, 1]} : vector<4x16x16xf32> to vector<4x16x14xf32>
    %cst = arith.constant 0.274068624 : f32
    %2 = vector.broadcast %cst : f32 to vector<4x16x14xf32>
    %3 = arith.mulf %2, %1 : vector<4x16x14xf32>
    %4 = vector.extract_strided_slice %0 {offsets = [0, 0, 1], sizes = [4, 16, 14], strides = [1, 1, 1]} : vector<4x16x16xf32> to vector<4x16x14xf32>
    %cst_2 = arith.constant 0.451862752 : f32
    %5 = vector.broadcast %cst_2 : f32 to vector<4x16x14xf32>
    %6 = arith.mulf %5, %4 : vector<4x16x14xf32>
    %7 = arith.addf %3, %6 : vector<4x16x14xf32>
    %8 = vector.extract_strided_slice %0 {offsets = [0, 0, 2], sizes = [4, 16, 14], strides = [1, 1, 1]} : vector<4x16x16xf32> to vector<4x16x14xf32>
    %cst_3 = arith.constant 0.274068624 : f32
    %9 = vector.broadcast %cst_3 : f32 to vector<4x16x14xf32>
    %10 = arith.mulf %9, %8 : vector<4x16x14xf32>
    %11 = arith.addf %7, %10 : vector<4x16x14xf32>
    %12 = vector.extract_strided_slice %11 {offsets = [0, 0, 0], sizes = [4, 14, 14], strides = [1, 1, 1]} : vector<4x16x14xf32> to vector<4x14x14xf32>
    %cst_4 = arith.constant 0.274068624 : f32
    %13 = vector.broadcast %cst_4 : f32 to vector<4x14x14xf32>
    %14 = arith.mulf %13, %12 : vector<4x14x14xf32>
    %15 = vector.extract_strided_slice %11 {offsets = [0, 1, 0], sizes = [4, 14, 14], strides = [1, 1, 1]} : vector<4x16x14xf32> to vector<4x14x14xf32>
    %cst_5 = arith.constant 0.451862752 : f32
    %16 = vector.broadcast %cst_5 : f32 to vector<4x14x14xf32>
    %17 = arith.mulf %16, %15 : vector<4x14x14xf32>
    %18 = arith.addf %14, %17 : vector<4x14x14xf32>
    %19 = vector.extract_strided_slice %11 {offsets = [0, 2, 0], sizes = [4, 14, 14], strides = [1, 1, 1]} : vector<4x16x14xf32> to vector<4x14x14xf32>
    %cst_6 = arith.constant 0.274068624 : f32
    %20 = vector.broadcast %cst_6 : f32 to vector<4x14x14xf32>
    %21 = arith.mulf %20, %19 : vector<4x14x14xf32>
    %22 = arith.addf %18, %21 : vector<4x14x14xf32>
    %c0_7 = arith.constant 0 : index
    %c0_8 = arith.constant 0 : index
    %c0_9 = arith.constant 0 : index
    %23 = vector.load %arg2[%c0_7, %c0_8, %c0_9] : memref<4x14x14xf32, #tpu.memory_space<vmem>>, vector<4x14x14xf32>
    tpu.vector_store %arg2[%c0_7, %c0_8, %c0_9], %22 {strides = array<i32>} : memref<4x14x14xf32, #tpu.memory_space<vmem>>, vector<4x14x14xf32>,
    return
  }
  func.func @transform_0(%arg0: i32) -> (i32, i32, i32) {
    %c0_i32 = arith.constant 0 : i32
    %c0_i32_0 = arith.constant 0 : i32
    %c0_i32_1 = arith.constant 0 : i32
    return %arg0, %c0_i32, %c0_i32_0 : i32, i32, i32
  }
  func.func @transform_1(%arg0: i32) -> (i32, i32, i32) {
    %c0_i32 = arith.constant 0 : i32
    %c0_i32_0 = arith.constant 0 : i32
    %c0_i32_1 = arith.constant 0 : i32
    return %arg0, %c0_i32, %c0_i32_0 : i32, i32, i32
  }
}

</mosaic_0001>

<bundles_post_ra>
// kernel: tpu_custom_call.1
= control target key start
LH: loop header
LB: loop body
LE: loop exit
PB: predicated region body
PF: predicated region fallthrough
CT: control target
= control target key end

     0   :  { %6 = vsyncpa [#allocation3], 0  ;;  %s685_s0 = inlined_call_operand.hbm [shape: f32[8,16,16], index: 0, kind: input, shape index: {}]   ;;  %s686_s1 = inlined_call_operand.vmem [shape: f32[8,14,14], index: 1, kind: output, shape index: {}]  }
   0x1   :  { %8 = vsyncpa [#allocation3 + $0x1], 0  ;;  %s555_s6 = smov 0   ;;  %s557_s7 = smov 0  }
   0x2   :  { %s559_s8 = smov 0   ;;  %s561_s9 = smov 0  }
   0x3 LB: > { %s415_s10 = sadd.s32 4294967295, %s538_s9   ;;  %s575_s11 = sadd.s32 1, %s538_s9   ;;  %s538_s9 = sphi %s561_s9, %s695_s9   ;;  %s534_s8 = sphi %s559_s8, %s694_s8   ;;  %s530_s7 = sphi %s557_s7, %s693_s7   ;;  %s526_s6 = sphi %s555_s6, %s692_s6  }
   0x4   : > { %s18_s12 = ssub.s32 %s538_s9, %s575_s11  ;;  %s21_s13 = sadd.s32 1, %s534_s8 }
   0x5   : > { %p19_p0 = scmp.eq.s32.totalorder %s18_s12, 0  ;;  %p28_p1 = scmp.ne.s32.totalorder %s534_s8, %s530_s7 }
   0x6   : > { %p29_p2 = scmp.eq.s32.totalorder %s538_s9, 0  ;;  %p34_p3 = scmp.ne.s32.totalorder %s530_s7, %s526_s6 }
   0x7   : > { %s585_s14 = scalar_select %p19_p0, %s534_s8, %s21_s13  }
   0x8   : > { %p30_p4 = por %p29_p2, %p28_p1  ;;  %p35_p5 = scmp.eq.s32.totalorder %s415_s10, 0 }
   0x9   : > { %p439_p6 = scmp.lt.s32.totalorder %s538_s9, 2  ;;  %s84_s16 = sand.u32 1, %s534_s8  }
   0xa   : > { %p590_p7 = por %p35_p5, %p34_p3  ;;  %s419_s17 = sshll.u32 %s84_s16, 6 }
   0xb   : > { %s431_s18 = sshll.u32 %s538_s9, 10  ;;  %s88_s22 = scalar_lea.vmem [#allocation2], %s419_s17 }
   0xc   : > { %s688_s15 = scalar_select %p590_p7, 1, 0 }
   0xd   : > { %s599_s21 = scalar_lea.hbm %s685_s0, %s431_s18  ;;  %s96_s23 = sshll.u32 %s88_s22, 4  ;;  %s601_s23 = int_to_ptr.vmem [resolvable:$true] %s96_s23 }
   0xe   : > { %p603_p8 = pnand %p439_p6, %p30_p4  ;;  %s608_s25 = scalar_lea.sflag [#allocation3], %s84_s16 }
   0xf   : > { %s476_s26 = scalar_lea.hbm %s599_s21, 1024  ;;  %s481_s29 = scalar_lea.hbm %s685_s0, 2048 }
  0x10   : > { %p477_p10 = scmp.ne.s32.totalorder %s599_s21, %s476_s26  ;;  %p478_p11 = pneg %p603_p8 }
  0x11   : > { %p482_p0 = scmp.lt.s32.totalorder %s599_s21, %s685_s0  ;;  %p483_p1 = scmp.lt.s32.totalorder %s481_s29, %s476_s26 }
  0x12   : > { %p479_p12 = pnand %p478_p11, %p477_p10 }
  0x13   : > { %p484_p2 = por %p483_p1, %p482_p0 }
  0x14   : > { %p480_p13 = pneg %p479_p12 }
  0x16   : > { %p485_p3 = pnand %p484_p2, %p480_p13 }
  0x18   : > { %488 = shalt.err (!%p485_p3)
}
  0x19   : > { %s489_s3 = scalar_lea.vmem %s601_s23, 1024  ;;  %s540_s4 = smov [#allocation2]  }
  0x1a   : > { %p490_p4 = scmp.ne.s32.totalorder %s601_s23, %s489_s3  ;;  %s494_s5 = sshll.u32 %s540_s4, 4  ;;  %s495_s5 = int_to_ptr.vmem [resolvable:$false] %s494_s5 }
  0x1b   : > { %s496_s6 = scalar_lea.vmem %s495_s5, 2048  ;;  %p497_p10 = scmp.lt.s32.totalorder %s601_s23, %s495_s5 }
  0x1c   : > { %p492_p5 = pnand %p490_p4, %p478_p11  ;;  %p498_p12 = scmp.lt.s32.totalorder %s496_s6, %s489_s3 }
  0x1e   : > { %p493_p6 = pneg %p492_p5  ;;  %p499_p9 = por %p498_p12, %p497_p10 }
  0x20   : > { %p500_p7 = pnand %p499_p9, %p493_p6 }
  0x22   : > { %503 = shalt.err (!%p500_p7)
}
  0x23   : > { %s541_s12 = smov 128   ;;  %s542_s13 = smov 8  }
  0x24   : > { %438 = dma.hbm_to_vmem [thread:$0]  (!%p603_p8), %s599_s21, 1024, %s601_s23, %s608_s25, %s541_s12, %s541_s12, %s542_s13  }
  0x25   : > { %p104_p11 = scmp.lt.s32.totalorder %s538_s9, 3  ;;  %p690_p13 = scmp.ge.s32.totalorder %s538_s9, 1 }
  0x27   : > { %p105_p0 = pnand %p690_p13, %p104_p11 }
  0x28   : > { %s110_s16 = sand.u32 (!%p105_p0), 1, %s530_s7   ;;  %p691_p7 = scmp.ne.s32.totalorder (!%p105_p0), %s688_s15, 0 }
  0x29   : > { %108 = sbr.rel (%p105_p0) target bundleno = 207 (0xcf), region = 24  ;;  %s424_s17 = sshll.u32 (!%p105_p0), %s110_s16, 6 }
  0x2a   : > { %s111_s18 = scalar_lea.sflag (!%p105_p0), [#allocation3], %s110_s16  ;;  %s114_s19 = scalar_lea.vmem (!%p105_p0), [#allocation2], %s424_s17 }
  0x2e   : > { %521 = dma.done.wait (%p691_p7), %s111_s18, 1024  }
  0x2f   : > { %523 = vsyncadd (%p691_p7), %s111_s18, 4294966272  ;;  %v144_v0 = vld [vmem:[%s114_s19 + $0x10] sm:$0xff]  ;;  %v142_v1 = vld [vmem:[%s114_s19] sm:$0xff]  ;;  %s543_s20 = smov 127   ;;  %s544_s15 = smov 126   ;;  %vm270_vm0 = vcmask 1046528  }
  0x30   : > { %v145_v2 = vld [vmem:[%s114_s19 + $0x18] sm:$0xff]  ;;  %v160_v3 = vmul.f32 0.45186275, %v144_v0  ;;  %v158_v4 = vmul.f32 0.45186275, %v142_v1  ;;  %v143_v5 = vld [vmem:[%s114_s19 + $0x8] sm:$0xff] }
  0x31   : > { %v161_v6 = vmul.f32 0.45186275, %v145_v2  ;;  %v159_v7 = vmul.f32 0.45186275, %v143_v5  ;;  %v147_v8 = vld [vmem:[%s114_s19 + $0x28] sm:$0xff]  ;;  %v146_v9 = vld [vmem:[%s114_s19 + $0x20] sm:$0xff] }
  0x32   : > { %178 = vrot.lane.b32.xlu1 %v160_v3, %s543_s20  ;;  %174 = vrot.lane.b32.xlu0 %v158_v4, %s543_s20  ;;  %v163_v10 = vmul.f32 0.45186275, %v147_v8  ;;  %v162_v11 = vmul.f32 0.45186275, %v146_v9  ;;  %v150_v12 = vmul.f32 0.27406862, %v142_v1 }
  0x33   : > { %v151_v13 = vmul.f32 0.27406862, %v143_v5  ;;  %v149_v14 = vld [vmem:[%s114_s19 + $0x38] sm:$0xff]  ;;  %v148_v15 = vld [vmem:[%s114_s19 + $0x30] sm:$0xff]  ;;  %v152_v18 = vmul.f32 0.27406862, %v144_v0 }
  0x34   : > { %v165_v16 = vmul.f32 0.45186275, %v149_v14  ;;  %v164_v17 = vmul.f32 0.45186275, %v148_v15  ;;  %v153_v19 = vmul.f32 0.27406862, %v145_v2 }
  0x35   : > { %v155_v20 = vmul.f32 0.27406862, %v147_v8  ;;  %v154_v21 = vmul.f32 0.27406862, %v146_v9  ;;  %v157_v22 = vmul.f32 0.27406862, %v149_v14 }
  0x36   : > { %180 = vrot.lane.b32.xlu1 %v161_v6, %s543_s20  ;;  %176 = vrot.lane.b32.xlu0 %v159_v7, %s543_s20  ;;  %v637_v23 = vmul.f32 0.27406862, %v148_v15  ;;  %s425_s21 = sshll.u32 %s415_s10, 2  ;;  %vm307_vm1 = vcmask 1045504   ;;  %vm338_vm2 = vcmask 111616   ;;  %vm336_vm3 = vcmask 113664  }
  0x37   : > { %p136_p8 = scmp.lt.s32.totalorder %s425_s21, 7 }
  0x39   : > { %s697_s21 = smov (!%p136_p8, %s425_s21), 7 }
  0x3a   : > { %184 = vrot.lane.b32.xlu1 %v163_v10, %s543_s20  ;;  %182 = vrot.lane.b32.xlu0 %v162_v11, %s543_s20  ;;  %s432_s22 = sshll.u32 %s697_s21, 4 }
  0x3b   : > { %s645_s23 = scalar_lea.vmem %s686_s1, %s432_s22 }
  0x3e   : > { %216 = vrot.lane.b32.xlu1 %v151_v13, %s544_s15  ;;  %214 = vrot.lane.b32.xlu0 %v150_v12, %s544_s15 }
  0x42   : > { %188 = vrot.lane.b32.xlu1 %v165_v16, %s543_s20  ;;  %186 = vrot.lane.b32.xlu0 %v164_v17, %s543_s20 }
  0x46   : > { %220 = vrot.lane.b32.xlu1 %v153_v19, %s544_s15  ;;  %218 = vrot.lane.b32.xlu0 %v152_v18, %s544_s15 }
  0x4a   : > { %224 = vrot.lane.b32.xlu1 %v155_v20, %s544_s15  ;;  %222 = vrot.lane.b32.xlu0 %v154_v21, %s544_s15 }
  0x4e   : > { %228 = vrot.lane.b32.xlu1 %v157_v22, %s544_s15  ;;  %226 = vrot.lane.b32.xlu0 %v637_v23, %s544_s15 }
  0xa4   : > { %v179_v24 = vpop.permute.xlu1 %178  ;;  %v175_v25 = vpop.permute.xlu0 %174 }
  0xa5   : > { %v198_v30 = vadd.f32 %v175_v25, %v150_v12  ;;  %v200_v46 = vadd.f32 %v179_v24, %v152_v18 }
  0xa8   : > { %v181_v26 = vpop.permute.xlu1 %180  ;;  %v177_v27 = vpop.permute.xlu0 %176 }
  0xa9   : > { %v199_v31 = vadd.f32 %v177_v27, %v151_v13  ;;  %v201_v47 = vadd.f32 %v181_v26, %v153_v19 }
  0xac   : > { %v185_v28 = vpop.permute.xlu1 %184  ;;  %v183_v29 = vpop.permute.xlu0 %182 }
  0xad   : > { %v203_v56 = vadd.f32 %v185_v28, %v155_v20  ;;  %v202_v62 = vadd.f32 %v183_v29, %v154_v21 }
  0xb0   : > { %v217_v32 = vpop.permute.xlu1 %216  ;;  %v215_v33 = vpop.permute.xlu0 %214 }
  0xb1   : > { %v239_v34 = vadd.f32 %v217_v32, %v199_v31  ;;  %v238_v35 = vadd.f32 %v215_v33, %v198_v30 }
  0xb3   : > { %v247_v36 = vmul.f32 0.27406862, %v239_v34  ;;  %v255_v37 = vmul.f32 0.45186275, %v239_v34  ;;  %v246_v38 = vmul.f32 0.27406862, %v238_v35 }
  0xb4   : > { %v254_v39 = vmul.f32 0.45186275, %v238_v35  ;;  %v189_v40 = vpop.permute.xlu1 %188  ;;  %v187_v41 = vpop.permute.xlu0 %186 }
  0xb5   : > { %v272_v42 = vrot.slane %v255_v37, 1  ;;  %v309_v43 = vrot.slane %v247_v36, 2  ;;  %v308_v45 = vrot.slane %v246_v38, 2  ;;  %v205_v6 = vadd.f32 %v189_v40, %v157_v22 }
  0xb6   : > { %v271_v44 = vrot.slane %v254_v39, 1  ;;  %v204_v9 = vadd.f32 %v187_v41, %v637_v23 }
  0xb7   : > { %v292_v48 = vadd.f32 %v272_v42, %v247_v36  ;;  %v310_v57 = vsel %vm307_vm1, %v308_v45, %v309_v43 }
  0xb8   : > { %v273_v49 = vsel %vm270_vm0, %v271_v44, %v272_v42  ;;  %v221_v50 = vpop.permute.xlu1 %220  ;;  %v219_v51 = vpop.permute.xlu0 %218 }
  0xb9   : > { %v329_v52 = vadd.f32 %v309_v43, %v292_v48  ;;  %v291_v53 = vadd.f32 %v273_v49, %v246_v38  ;;  %v241_v54 = vadd.f32 %v221_v50, %v201_v47  ;;  %v240_v55 = vadd.f32 %v219_v51, %v200_v46 }
  0xbb   : > { %339 = vst.msk [vmem:[%s645_s23 + $0x8] sm:$0x3f] %vm338_vm2, %v329_v52  ;;  %v328_v58 = vadd.f32 %v310_v57, %v291_v53  ;;  %v249_v59 = vmul.f32 0.27406862, %v241_v54  ;;  %v257_v60 = vmul.f32 0.45186275, %v241_v54 }
  0xbc   : > { %v248_v61 = vmul.f32 0.27406862, %v240_v55  ;;  %v256_v63 = vmul.f32 0.45186275, %v240_v55  ;;  %v225_v0 = vpop.permute.xlu1 %224  ;;  %v223_v1 = vpop.permute.xlu0 %222 }
  0xbd   : > { %337 = vst.msk [vmem:[%s645_s23] sm:$0xff] %vm336_vm3, %v328_v58  ;;  %v275_v2 = vrot.slane %v257_v60, 1  ;;  %v312_v3 = vrot.slane %v249_v59, 2  ;;  %v243_v5 = vadd.f32 %v225_v0, %v203_v56  ;;  %v242_v8 = vadd.f32 %v223_v1, %v202_v62 }
  0xbe   : > { %v311_v4 = vrot.slane %v248_v61, 2  ;;  %v274_v7 = vrot.slane %v256_v63, 1 }
  0xbf   : > { %v294_v10 = vadd.f32 %v275_v2, %v249_v59  ;;  %v251_v11 = vmul.f32 0.27406862, %v243_v5  ;;  %v259_v12 = vmul.f32 0.45186275, %v243_v5  ;;  %v250_v15 = vmul.f32 0.27406862, %v242_v8 }
  0xc0   : > { %v276_v13 = vsel %vm270_vm0, %v274_v7, %v275_v2  ;;  %v313_v14 = vsel %vm307_vm1, %v311_v4, %v312_v3  ;;  %v258_v16 = vmul.f32 0.45186275, %v242_v8  ;;  %v229_v17 = vpop.permute.xlu1 %228  ;;  %v227_v18 = vpop.permute.xlu0 %226 }
  0xc1   : > { %v331_v19 = vadd.f32 %v312_v3, %v294_v10  ;;  %v293_v20 = vadd.f32 %v276_v13, %v248_v61  ;;  %v278_v21 = vrot.slane %v259_v12, 1  ;;  %v315_v22 = vrot.slane %v251_v11, 2 }
  0xc2   : > { %v277_v24 = vrot.slane %v258_v16, 1  ;;  %v314_v25 = vrot.slane %v250_v15, 2  ;;  %v245_v23 = vadd.f32 %v229_v17, %v205_v6  ;;  %v244_v26 = vadd.f32 %v227_v18, %v204_v9 }
  0xc3   : > { %341 = vst.msk [vmem:[%s645_s23 + $0x18] sm:$0x3f] %vm338_vm2, %v331_v19  ;;  %v330_v27 = vadd.f32 %v313_v14, %v293_v20  ;;  %v296_v28 = vadd.f32 %v278_v21, %v251_v11 }
  0xc4   : > { %v279_v29 = vsel %vm270_vm0, %v277_v24, %v278_v21  ;;  %v253_v30 = vmul.f32 0.27406862, %v245_v23  ;;  %v261_v31 = vmul.f32 0.45186275, %v245_v23  ;;  %v252_v34 = vmul.f32 0.27406862, %v244_v26 }
  0xc5   : > { %340 = vst.msk [vmem:[%s645_s23 + $0x10] sm:$0xff] %vm336_vm3, %v330_v27  ;;  %v333_v32 = vadd.f32 %v315_v22, %v296_v28  ;;  %v295_v33 = vadd.f32 %v279_v29, %v250_v15  ;;  %v260_v35 = vmul.f32 0.45186275, %v244_v26  ;;  %v316_v36 = vsel %vm307_vm1, %v314_v25, %v315_v22 }
  0xc6   : > { %v281_v37 = vrot.slane %v261_v31, 1  ;;  %v318_v39 = vrot.slane %v253_v30, 2  ;;  %v317_v41 = vrot.slane %v252_v34, 2 }
  0xc7   : > { %343 = vst.msk [vmem:[%s645_s23 + $0x28] sm:$0x3f] %vm338_vm2, %v333_v32  ;;  %v332_v38 = vadd.f32 %v316_v36, %v295_v33  ;;  %v280_v40 = vrot.slane %v260_v35, 1 }
  0xc8   : > { %v298_v42 = vadd.f32 %v281_v37, %v253_v30  ;;  %v319_v46 = vsel %vm307_vm1, %v317_v41, %v318_v39 }
  0xc9   : > { %342 = vst.msk [vmem:[%s645_s23 + $0x20] sm:$0xff] %vm336_vm3, %v332_v38  ;;  %v282_v43 = vsel %vm270_vm0, %v280_v40, %v281_v37 }
  0xca   : > { %v335_v44 = vadd.f32 %v318_v39, %v298_v42  ;;  %v297_v45 = vadd.f32 %v282_v43, %v252_v34 }
  0xcc   : > { %345 = vst.msk [vmem:[%s645_s23 + $0x38] sm:$0x3f] %vm338_vm2, %v335_v44  ;;  %v334_v47 = vadd.f32 %v319_v46, %v297_v45 }
  0xce   : > { %344 = vst.msk [vmem:[%s645_s23 + $0x30] sm:$0xff] %vm336_vm3, %v334_v47 }
  0xcf PF: > { %p11_p9 = scmp.ge.s32.totalorder %s575_s11, 4   ;;  %s692_s6 = smov %s530_s7 }
  0xd0   : > { %s693_s7 = smov %s534_s8  ;;  %s694_s8 = smov %s585_s14 }
  0xd1   : > { %s695_s9 = smov %s575_s11  ;;  %13 = sbr.rel (!%p11_p9) target bundleno = 3 (0x3), region = 64 }
  0xd6   :  { %370 = vsyncpa [#allocation3], 1 }
  0xd7   :  { %372 = vsyncpa [#allocation3 + $0x1], 1 }

</bundles_post_ra>
